<compile_context>
chip_gen: v6e
topology: v6e:2x2x1
jax: 0.10.0
libtpu: 0.0.40
codegen_flags: <defaults>
</compile_context>

<pallas_src>
import jax
import jax.numpy as jnp
from jax.experimental import pallas as pl
from jax.experimental.pallas import tpu as pltpu

INPUT_SIZE = 11
N1, N2, N3 = 64, 32, 16
BN_EPS = 1e-5

PAD = 128      # lane-aligned hidden width used inside the kernel
TB_MAX = 512   # batch tile (multiple of 128; fits VMEM budget on v5e/v6e/v7x)


def _mlp_kernel(x_ref, w1_ref, w23_ref, p_ref, o_ref):
    # x_ref:   (TB, INPUT_SIZE)   input tile (unpadded feature lanes)
    # w1_ref:  (INPUT_SIZE, PAD)  folded layer-1 weight, output dim zero-padded
    # w23_ref: (2, PAD, PAD)      folded layer-2/3 weights, zero-padded
    # p_ref:   (8, PAD)           rows 0..2 = biases 1..3 (padded),
    #                             row 3 = w4^T (padded), row 4 lane 0 = b4
    # o_ref:   (TB, 1)            output tile (lane-narrow writeback)
    x = x_ref[...]
    h = jnp.dot(x, w1_ref[...], preferred_element_type=jnp.float32)
    h = jnp.maximum(h + p_ref[0:1, :], 0.0)
    h = jnp.dot(h, w23_ref[0], preferred_element_type=jnp.float32)
    h = jnp.maximum(h + p_ref[1:2, :], 0.0)
    h = jnp.dot(h, w23_ref[1], preferred_element_type=jnp.float32)
    h = jnp.maximum(h + p_ref[2:3, :], 0.0)
    # Final Linear(16 -> 1): multiply by w4 row and reduce over lanes -> (TB, 1).
    y = jnp.sum(h * p_ref[3:4, :], axis=-1, keepdims=True) + p_ref[4:5, 0:1]
    o_ref[...] = y


def _pad2(a, rows, cols):
    return jnp.zeros((rows, cols), a.dtype).at[: a.shape[0], : a.shape[1]].set(a)


def prepare_params(params):
    """Fold BatchNorm (eval / running stats) into the linears and pack operands.

    Done once, hoisted out of the per-forward path. Zero padding is exact for
    this Linear+ReLU chain: padded input features hit zero weight rows, padded
    outputs get zero bias and ReLU(0) = 0, so they stay zero downstream."""
    def fold(w, b, gamma, beta, mean, var):
        scale = gamma / jnp.sqrt(var + BN_EPS)        # (out,)
        return w * scale[None, :], (b - mean) * scale + beta

    w1, b1 = fold(params["w1"], params["b1"], params["g1"], params["be1"],
                  params["m1"], params["v1"])
    w2, b2 = fold(params["w2"], params["b2"], params["g2"], params["be2"],
                  params["m2"], params["v2"])
    w3, b3 = fold(params["w3"], params["b3"], params["g3"], params["be3"],
                  params["m3"], params["v3"])
    w4, b4 = params["w4"], params["b4"]

    w1p = _pad2(w1, INPUT_SIZE, PAD)                                  # (11, 128)
    w23 = jnp.stack([_pad2(w2, PAD, PAD), _pad2(w3, PAD, PAD)])       # (2,128,128)
    p = jnp.zeros((8, PAD), jnp.float32)
    p = p.at[0, :N1].set(b1)
    p = p.at[1, :N2].set(b2)
    p = p.at[2, :N3].set(b3)
    p = p.at[3, :N3].set(w4[:, 0])
    p = p.at[4, 0].set(b4[0])
    return {"w1": w1p, "w23": w23, "p": p}


def dnn_forward(x, prep):
    """x: (B, INPUT_SIZE) float32. Returns (B, 1) float32 (eval-mode forward)."""
    B = x.shape[0]
    # Batch tile: a single tile for small B (at B~8 the call is pure fixed
    # overhead anyway -- batch requests upstream to amortize it); TB_MAX-row
    # tiles with a parallel grid for large B.
    if B <= TB_MAX:
        tb = max(8, ((B + 7) // 8) * 8)
    else:
        tb = TB_MAX
    b_pad = ((B + tb - 1) // tb) * tb
    xp = x if b_pad == B else jnp.zeros((b_pad, INPUT_SIZE), x.dtype).at[:B].set(x)

    out = pl.pallas_call(
        _mlp_kernel,
        out_shape=jax.ShapeDtypeStruct((b_pad, 1), jnp.float32),
        grid=(b_pad // tb,),
        in_specs=[
            pl.BlockSpec((tb, INPUT_SIZE), lambda i: (i, 0)),     # x: batch-tiled
            pl.BlockSpec((INPUT_SIZE, PAD), lambda i: (0, 0)),    # w1: VMEM-resident
            pl.BlockSpec((2, PAD, PAD), lambda i: (0, 0, 0)),     # w2/w3 stack
            pl.BlockSpec((8, PAD), lambda i: (0, 0)),             # biases + w4 row
        ],
        out_specs=pl.BlockSpec((tb, 1), lambda i: (i, 0)),
        compiler_params=pltpu.CompilerParams(
            dimension_semantics=("parallel",)),
    )(xp, prep["w1"], prep["w23"], prep["p"])
    return out[:B]


def init_params(key):
    ks = jax.random.split(key, 16)
    dims = [(INPUT_SIZE, N1), (N1, N2), (N2, N3), (N3, 1)]
    params = {}
    for i, (din, dout) in enumerate(dims, start=1):
        bound = 1.0 / jnp.sqrt(din)
        params[f"w{i}"] = jax.random.uniform(
            ks[2 * i - 2], (din, dout), jnp.float32, -bound, bound)
        params[f"b{i}"] = jax.random.uniform(
            ks[2 * i - 1], (dout,), jnp.float32, -bound, bound)
    # BatchNorm params (deterministic, non-trivial running stats).
    for i, d in enumerate([N1, N2, N3], start=1):
        params[f"g{i}"] = 1.0 + 0.1 * jax.random.normal(ks[8 + i], (d,), jnp.float32)
        params[f"be{i}"] = 0.05 * jax.random.normal(ks[11 + i], (d,), jnp.float32)
        params[f"m{i}"] = 0.1 * jnp.arange(d, dtype=jnp.float32) / d
        params[f"v{i}"] = 1.0 + 0.01 * jnp.arange(d, dtype=jnp.float32)
    return params


def _reference(x, params):
    def fold(w, b, g, be, m, v):
        s = g / jnp.sqrt(v + BN_EPS)
        return w * s[None, :], (b - m) * s + be
    h = x
    for i in range(1, 4):
        w, b = fold(params[f"w{i}"], params[f"b{i}"], params[f"g{i}"],
                    params[f"be{i}"], params[f"m{i}"], params[f"v{i}"])
        h = jnp.maximum(h @ w + b, 0.0)
    return h @ params["w4"] + params["b4"]


if __name__ == "__main__":
    key = jax.random.PRNGKey(0)
    kx, kp = jax.random.split(key)
    B = 8
    x = jax.random.normal(kx, (B, INPUT_SIZE), jnp.float32)
    params = init_params(kp)

    prep = prepare_params(params)     # fold + pack once (hoisted out of forward)
    y = dnn_forward(x, prep)
    jax.block_until_ready(y)

    y_ref = _reference(x, params)
    assert y.shape == (B, 1)
    assert jnp.allclose(y, y_ref, atol=1e-4, rtol=1e-4)
    print("KERNEL_OK")
</pallas_src>

<mosaic_0001>
module attributes {stable_mosaic.version = 11 : i64} {
  func.func @_mlp_kernel(%arg0: i32, %arg1: memref<8x11xf32, #tpu.memory_space<vmem>>, %arg2: memref<11x128xf32, #tpu.memory_space<vmem>>, %arg3: memref<2x128x128xf32, #tpu.memory_space<vmem>>, %arg4: memref<8x128xf32, #tpu.memory_space<vmem>>, %arg5: memref<8x1xf32, #tpu.memory_space<vmem>>) attributes {dimension_semantics = [#tpu.dimension_semantics<parallel>], iteration_bounds = array<i64: 1>, scalar_prefetch = 0 : i64, scratch_operands = 0 : i64, tpu.core_type = #tpu.core_type<tc>, window_params = [{transform_indices = @transform_0, window_bounds = array<i64: 8, 11>}, {pipeline_mode = #tpu.pipeline_mode<synchronous>, transform_indices = @transform_1, window_bounds = array<i64: 11, 128>}, {pipeline_mode = #tpu.pipeline_mode<synchronous>, transform_indices = @transform_2, window_bounds = array<i64: 2, 128, 128>}, {pipeline_mode = #tpu.pipeline_mode<synchronous>, transform_indices = @transform_3, window_bounds = array<i64: 8, 128>}, {transform_indices = @transform_4, window_bounds = array<i64: 8, 1>}]} {
    %c0 = arith.constant 0 : index
    %c0_0 = arith.constant 0 : index
    %0 = vector.load %arg1[%c0, %c0_0] : memref<8x11xf32, #tpu.memory_space<vmem>>, vector<8x11xf32>
    %c0_1 = arith.constant 0 : index
    %c0_2 = arith.constant 0 : index
    %1 = vector.load %arg2[%c0_1, %c0_2] : memref<11x128xf32, #tpu.memory_space<vmem>>, vector<11x128xf32>
    %cst = arith.constant dense<0.000000e+00> : vector<8x128xf32>
    %2 = tpu.matmul %0, %1, %cst {dimension_numbers = #tpu.dot_dimension_numbers<[1], [0], [0], [1], [0, 0, 1, 1], [], []>} : vector<8x11xf32>, vector<11x128xf32>, vector<8x128xf32> -> vector<8x128xf32>
    %c0_3 = arith.constant 0 : index
    %c0_4 = arith.constant 0 : index
    %3 = vector.load %arg4[%c0_3, %c0_4] : memref<8x128xf32, #tpu.memory_space<vmem>>, vector<1x128xf32>
    %4 = vector.broadcast %3 : vector<1x128xf32> to vector<8x128xf32>
    %5 = arith.addf %2, %4 : vector<8x128xf32>
    %cst_5 = arith.constant 0.000000e+00 : f32
    %6 = vector.broadcast %cst_5 : f32 to vector<8x128xf32>
    %7 = arith.maximumf %5, %6 : vector<8x128xf32>
    %c0_6 = arith.constant 0 : index
    %c0_7 = arith.constant 0 : index
    %c0_8 = arith.constant 0 : index
    %8 = vector.load %arg3[%c0_6, %c0_7, %c0_8] : memref<2x128x128xf32, #tpu.memory_space<vmem>>, vector<1x128x128xf32>
    %9 = vector.shape_cast %8 : vector<1x128x128xf32> to vector<128x128xf32>
    %cst_9 = arith.constant dense<0.000000e+00> : vector<8x128xf32>
    %10 = tpu.matmul %7, %9, %cst_9 {dimension_numbers = #tpu.dot_dimension_numbers<[1], [0], [0], [1], [0, 0, 1, 1], [], []>} : vector<8x128xf32>, vector<128x128xf32>, vector<8x128xf32> -> vector<8x128xf32>
    %c1 = arith.constant 1 : index
    %c0_10 = arith.constant 0 : index
    %11 = vector.load %arg4[%c1, %c0_10] : memref<8x128xf32, #tpu.memory_space<vmem>>, vector<1x128xf32>
    %12 = vector.broadcast %11 : vector<1x128xf32> to vector<8x128xf32>
    %13 = arith.addf %10, %12 : vector<8x128xf32>
    %cst_11 = arith.constant 0.000000e+00 : f32
    %14 = vector.broadcast %cst_11 : f32 to vector<8x128xf32>
    %15 = arith.maximumf %13, %14 : vector<8x128xf32>
    %c1_12 = arith.constant 1 : index
    %c0_13 = arith.constant 0 : index
    %c0_14 = arith.constant 0 : index
    %16 = vector.load %arg3[%c1_12, %c0_13, %c0_14] : memref<2x128x128xf32, #tpu.memory_space<vmem>>, vector<1x128x128xf32>
    %17 = vector.shape_cast %16 : vector<1x128x128xf32> to vector<128x128xf32>
    %cst_15 = arith.constant dense<0.000000e+00> : vector<8x128xf32>
    %18 = tpu.matmul %15, %17, %cst_15 {dimension_numbers = #tpu.dot_dimension_numbers<[1], [0], [0], [1], [0, 0, 1, 1], [], []>} : vector<8x128xf32>, vector<128x128xf32>, vector<8x128xf32> -> vector<8x128xf32>
    %c2 = arith.constant 2 : index
    %c0_16 = arith.constant 0 : index
    %19 = vector.load %arg4[%c2, %c0_16] : memref<8x128xf32, #tpu.memory_space<vmem>>, vector<1x128xf32>
    %20 = vector.broadcast %19 : vector<1x128xf32> to vector<8x128xf32>
    %21 = arith.addf %18, %20 : vector<8x128xf32>
    %cst_17 = arith.constant 0.000000e+00 : f32
    %22 = vector.broadcast %cst_17 : f32 to vector<8x128xf32>
    %23 = arith.maximumf %21, %22 : vector<8x128xf32>
    %c3 = arith.constant 3 : index
    %c0_18 = arith.constant 0 : index
    %24 = vector.load %arg4[%c3, %c0_18] : memref<8x128xf32, #tpu.memory_space<vmem>>, vector<1x128xf32>
    %25 = vector.broadcast %24 : vector<1x128xf32> to vector<8x128xf32>
    %26 = arith.mulf %23, %25 : vector<8x128xf32>
    %cst_19 = arith.constant dense<0.000000e+00> : vector<8xf32>
    %27 = vector.multi_reduction <add>, %26, %cst_19 [1] : vector<8x128xf32> to vector<8xf32>
    %28 = vector.shape_cast %27 : vector<8xf32> to vector<8x1xf32>
    %c4 = arith.constant 4 : index
    %c0_20 = arith.constant 0 : index
    %29 = vector.load %arg4[%c4, %c0_20] : memref<8x128xf32, #tpu.memory_space<vmem>>, vector<1x1xf32>
    %30 = vector.broadcast %29 : vector<1x1xf32> to vector<8x1xf32>
    %31 = arith.addf %28, %30 : vector<8x1xf32>
    %c0_21 = arith.constant 0 : index
    %c0_22 = arith.constant 0 : index
    %32 = vector.load %arg5[%c0_21, %c0_22] : memref<8x1xf32, #tpu.memory_space<vmem>>, vector<8x1xf32>
    tpu.vector_store %arg5[%c0_21, %c0_22], %31 {strides = array<i32>} : memref<8x1xf32, #tpu.memory_space<vmem>>, vector<8x1xf32>,
    return
  }
  func.func @transform_0(%arg0: i32) -> (i32, i32) {
    %c0_i32 = arith.constant 0 : i32
    %c0_i32_0 = arith.constant 0 : i32
    return %arg0, %c0_i32 : i32, i32
  }
  func.func @transform_1(%arg0: i32) -> (i32, i32) {
    %c0_i32 = arith.constant 0 : i32
    %c0_i32_0 = arith.constant 0 : i32
    %c0_i32_1 = arith.constant 0 : i32
    return %c0_i32, %c0_i32_0 : i32, i32
  }
  func.func @transform_2(%arg0: i32) -> (i32, i32, i32) {
    %c0_i32 = arith.constant 0 : i32
    %c0_i32_0 = arith.constant 0 : i32
    %c0_i32_1 = arith.constant 0 : i32
    %c0_i32_2 = arith.constant 0 : i32
    return %c0_i32, %c0_i32_0, %c0_i32_1 : i32, i32, i32
  }
  func.func @transform_3(%arg0: i32) -> (i32, i32) {
    %c0_i32 = arith.constant 0 : i32
    %c0_i32_0 = arith.constant 0 : i32
    %c0_i32_1 = arith.constant 0 : i32
    return %c0_i32, %c0_i32_0 : i32, i32
  }
  func.func @transform_4(%arg0: i32) -> (i32, i32) {
    %c0_i32 = arith.constant 0 : i32
    %c0_i32_0 = arith.constant 0 : i32
    return %arg0, %c0_i32 : i32, i32
  }
}

</mosaic_0001>

<bundles_post_ra>
// kernel: tpu_custom_call.1
= control target key start
LH: loop header
LB: loop body
LE: loop exit
PB: predicated region body
PF: predicated region fallthrough
CT: control target
= control target key end

     0   :  { %9 = vsyncpa [#allocation3], 0  ;;  %s666_s0 = inlined_call_operand.hbm [shape: f32[8,11], index: 0, kind: input, shape index: {}]   ;;  %s667_s1 = inlined_call_operand.hbm [shape: f32[11,128], index: 1, kind: input, shape index: {}]   ;;  %s668_s2 = inlined_call_operand.hbm [shape: f32[2,128,128], index: 2, kind: input, shape index: {}]   ;;  %s669_s3 = inlined_call_operand.hbm [shape: f32[8,128], index: 3, kind: input, shape index: {}]   ;;  %s670_s4 = inlined_call_operand.vmem [shape: f32[8,1], index: 4, kind: output, shape index: {}]  }
   0x1   :  { %10 = vsyncpa [#allocation5], 0 }
   0x2   :  { %11 = vsyncpa [#allocation8], 0  ;;  %s578_s15 = smov [#allocation4]  }
   0x3   :  { %s27_s16 = sshll.u32 %s578_s15, 4  ;;  %s28_s16 = int_to_ptr.vmem [resolvable:$true] %s27_s16 }
   0x4   :  { %s500_s17 = scalar_lea.vmem %s28_s16, 256  ;;  %p505_p1 = scmp.lt.s32.totalorder %s28_s16, %s28_s16 }
   0x5   :  { %p501_p0 = scmp.ne.s32.totalorder %s28_s16, %s500_s17  ;;  %p506_p2 = scmp.lt.s32.totalorder %s500_s17, %s500_s17 }
   0x7   :  { %p507_p3 = por %p506_p2, %p505_p1 }
   0x9   :  { %p508_p4 = pnand %p507_p3, %p501_p0 }
   0xb   :  { %511 = shalt.err (!%p508_p4)
}
   0xc   :  { %s579_s18 = smov 128   ;;  %s580_s19 = smov 8  }
   0xd   :  { %33 = dma.hbm_to_vmem [thread:$0]  %s667_s1, 256, %s28_s16, [#allocation5], %s579_s18, %s579_s18, %s580_s19  }
   0xe   :  { %s581_s22 = smov [#allocation2]   ;;  %s582_s24 = smov [#allocation6]  }
   0xf   :  { %s18_s23 = sshll.u32 %s581_s22, 4  ;;  %s39_s25 = sshll.u32 %s582_s24, 4  ;;  %s19_s23 = int_to_ptr.vmem [resolvable:$true] %s18_s23  ;;  %s40_s25 = int_to_ptr.vmem [resolvable:$true] %s39_s25 }
  0x10   :  { %s520_s26 = scalar_lea.vmem %s19_s23, 128  ;;  %p525_p6 = scmp.lt.s32.totalorder %s19_s23, %s19_s23 }
  0x11   :  { %p521_p5 = scmp.ne.s32.totalorder %s19_s23, %s520_s26  ;;  %p526_p7 = scmp.lt.s32.totalorder %s520_s26, %s520_s26 }
  0x13   :  { %p527_p8 = por %p526_p7, %p525_p6 }
  0x15   :  { %p528_p9 = pnand %p527_p8, %p521_p5 }
  0x17   :  { %531 = shalt.err (!%p528_p9)
}
  0x18   :  { %21 = dma.hbm_to_vmem [thread:$0]  %s666_s0, 128, %s19_s23, [#allocation3]  }
  0x19   :  { %s540_s29 = scalar_lea.vmem %s40_s25, 4096  ;;  %p545_p11 = scmp.lt.s32.totalorder %s40_s25, %s40_s25 }
  0x1a   :  { %p541_p10 = scmp.ne.s32.totalorder %s40_s25, %s540_s29  ;;  %p546_p12 = scmp.lt.s32.totalorder %s540_s29, %s540_s29 }
  0x1c   :  { %p547_p13 = por %p546_p12, %p545_p11 }
  0x1e   :  { %p548_p0 = pnand %p547_p13, %p541_p10 }
  0x20   :  { %551 = shalt.err (!%p548_p0)
}
  0x21   :  { %45 = dma.hbm_to_vmem [thread:$0]  %s668_s2, 4096, %s40_s25, [#allocation5], %s579_s18, %s579_s18, %s580_s19  }
  0x22   :  { %s583_s5 = smov [#allocation7]  }
  0x23   :  { %s52_s6 = sshll.u32 %s583_s5, 4  ;;  %s53_s6 = int_to_ptr.vmem [resolvable:$true] %s52_s6 }
  0x24   :  { %s560_s7 = scalar_lea.vmem %s53_s6, 128  ;;  %p565_p2 = scmp.lt.s32.totalorder %s53_s6, %s53_s6 }
  0x25   :  { %p561_p1 = scmp.ne.s32.totalorder %s53_s6, %s560_s7  ;;  %p566_p3 = scmp.lt.s32.totalorder %s560_s7, %s560_s7 }
  0x27   :  { %p567_p4 = por %p566_p3, %p565_p2 }
  0x29   :  { %p568_p5 = pnand %p567_p4, %p561_p1 }
  0x2b   :  { %571 = shalt.err (!%p568_p5)
}
  0x2c   :  { %55 = dma.hbm_to_vmem [thread:$0]  %s669_s3, 128, %s53_s6, [#allocation8]  }
  0x2d   :  { %572 = dma.done.wait [#allocation3], 128  }
  0x2e   :  { %573 = vsyncadd [#allocation3], 4294967168 }
  0x2f   :  { %574 = dma.done.wait [#allocation5], 4352  }
  0x30   :  { %575 = vsyncadd [#allocation5], 4294962944 }
  0x31   :  { %576 = dma.done.wait [#allocation8], 128  }
  0x32   :  { %577 = vsyncadd [#allocation8], 4294967168  ;;  %v584_v0 = vmov 0.0   ;;  %vm585_vm0 = vmmov 0   ;;  %vm80_vm1 = vcmask 1042432   ;;  %v69_v2 = vld [vmem:[#allocation4] sm:$0xff] }
  0x33   :  { %407 = vmatprep.subr.mxu0 %v584_v0  ;;  %411 = vmatprep.mubr.msk.f32.mxu0 %vm585_vm0, %v584_v0  ;;  %v70_v1 = vld [vmem:[#allocation4 + $0x8] sm:$0x7]  ;;  %v68_v3 = vld [vmem:[#allocation2] sm:$0xff]  ;;  %vm76_vm2 = vcmask 89088   ;;  %v169_v5 = vld [vmem:[#allocation6 + $0x70] sm:$0xff]  ;;  %vm354_vm3 = vcmask 7168  }
  0x34   :  { %414 = vmatprep.subr.mxu1 %v584_v0  ;;  %446 = vmatprep.mubr.msk.f32.mxu1 %vm585_vm0, %v584_v0  ;;  %v170_v4 = vld [vmem:[#allocation6 + $0x78] sm:$0xff]  ;;  %v168_v6 = vld [vmem:[#allocation6 + $0x68] sm:$0xff]  ;;  %v167_v7 = vld [vmem:[#allocation6 + $0x60] sm:$0xff] }
  0x35   :  { %408 = vmatpush3.msk.msra.mxu0 %vm80_vm1, %v70_v1  ;;  %415 = vmatpush3.msra.mxu1 %v170_v4  ;;  %v166_v8 = vld [vmem:[#allocation6 + $0x58] sm:$0xff]  ;;  %v165_v9 = vld [vmem:[#allocation6 + $0x50] sm:$0xff]  ;;  %v164_v10 = vld [vmem:[#allocation6 + $0x48] sm:$0xff] }
  0x36   :  { %409 = vmatprep.subr.mxu0 %v584_v0  ;;  %416 = vmatprep.subr.mxu1 %v584_v0  ;;  %v163_v11 = vld [vmem:[#allocation6 + $0x40] sm:$0xff]  ;;  %v162_v12 = vld [vmem:[#allocation6 + $0x38] sm:$0xff]  ;;  %v161_v13 = vld [vmem:[#allocation6 + $0x30] sm:$0xff] }
  0x37   :  { %410 = vmatpush3.msra.mxu0 %v69_v2  ;;  %417 = vmatpush3.msra.mxu1 %v169_v5  ;;  %v160_v14 = vld [vmem:[#allocation6 + $0x28] sm:$0xff]  ;;  %v159_v15 = vld [vmem:[#allocation6 + $0x20] sm:$0xff]  ;;  %v158_v16 = vld [vmem:[#allocation6 + $0x18] sm:$0xff] }
  0x38   :  { %412 = vmatmul.mubr.msk.f32.vlgmr.msra.gmra.mxu0 %vm76_vm2, %v68_v3  ;;  %418 = vmatprep.subr.mxu1 %v584_v0  ;;  %v157_v17 = vld [vmem:[#allocation6 + $0x10] sm:$0xff]  ;;  %v156_v18 = vld [vmem:[#allocation6 + $0x8] sm:$0xff]  ;;  %v155_v19 = vld [vmem:[#allocation6] sm:$0xff] }
  0x39   :  { %449 = vmatprep.subr.mxu0 %v584_v0  ;;  %419 = vmatpush3.msra.mxu1 %v168_v6  ;;  %v263_v20 = vld [vmem:[#allocation6 + $0xf8] sm:$0xff]  ;;  %v262_v21 = vld [vmem:[#allocation6 + $0xf0] sm:$0xff]  ;;  %v261_v22 = vld [vmem:[#allocation6 + $0xe8] sm:$0xff] }
  0x3a   :  { %481 = vmatprep.mubr.msk.f32.mxu0 %vm585_vm0, %v584_v0  ;;  %420 = vmatprep.subr.mxu1 %v584_v0  ;;  %v260_v23 = vld [vmem:[#allocation6 + $0xe0] sm:$0xff]  ;;  %v259_v24 = vld [vmem:[#allocation6 + $0xd8] sm:$0xff]  ;;  %v258_v25 = vld [vmem:[#allocation6 + $0xd0] sm:$0xff] }
  0x3b   :  { %421 = vmatpush3.msra.mxu1 %v167_v7  ;;  %450 = vmatpush3.msra.mxu0 %v263_v20  ;;  %v257_v26 = vld [vmem:[#allocation6 + $0xc8] sm:$0xff]  ;;  %v256_v27 = vld [vmem:[#allocation6 + $0xc0] sm:$0xff]  ;;  %v255_v28 = vld [vmem:[#allocation6 + $0xb8] sm:$0xff] }
  0x3c   :  { %422 = vmatprep.subr.mxu1 %v584_v0  ;;  %451 = vmatprep.subr.mxu0 %v584_v0  ;;  %v254_v29 = vld [vmem:[#allocation6 + $0xb0] sm:$0xff]  ;;  %v253_v30 = vld [vmem:[#allocation6 + $0xa8] sm:$0xff]  ;;  %v252_v31 = vld [vmem:[#allocation6 + $0xa0] sm:$0xff] }
  0x3d   :  { %423 = vmatpush3.msra.mxu1 %v166_v8  ;;  %452 = vmatpush3.msra.mxu0 %v262_v21  ;;  %v251_v32 = vld [vmem:[#allocation6 + $0x98] sm:$0xff]  ;;  %v363_v33 = vld [vmem:[#allocation7] ss:$0 sm:$0xff]  ;;  %v250_v38 = vld [vmem:[#allocation6 + $0x90] sm:$0xff] }
  0x3e   :  { %424 = vmatprep.subr.mxu1 %v584_v0  ;;  %453 = vmatprep.subr.mxu0 %v584_v0  ;;  %v249_v39 = vld [vmem:[#allocation6 + $0x88] sm:$0xff]  ;;  %v248_v40 = vld [vmem:[#allocation6 + $0x80] sm:$0xff] }
  0x3f   :  { %425 = vmatpush3.msra.mxu1 %v165_v9  ;;  %454 = vmatpush3.msra.mxu0 %v261_v22  ;;  %v366_v41 = vld [vmem:[#allocation7 + $0x1] ss:$0 sm:$0xff]  ;;  %v367_v46 = vld [vmem:[#allocation7 + $0x2] ss:$0 sm:$0xff]  ;;  %v368_v50 = vld [vmem:[#allocation7 + $0x3] ss:$0 sm:$0xff] }
  0x40   :  { %426 = vmatprep.subr.mxu1 %v584_v0  ;;  %455 = vmatprep.subr.mxu0 %v584_v0  ;;  %v369_v53 = vld [vmem:[#allocation7 + $0x4] ss:$0 sm:$0xff] }
  0x41   :  { %427 = vmatpush3.msra.mxu1 %v164_v10  ;;  %456 = vmatpush3.msra.mxu0 %v260_v23 }
  0x42   :  { %428 = vmatprep.subr.mxu1 %v584_v0  ;;  %457 = vmatprep.subr.mxu0 %v584_v0 }
  0x43   :  { %429 = vmatpush3.msra.mxu1 %v163_v11  ;;  %458 = vmatpush3.msra.mxu0 %v259_v24 }
  0x44   :  { %430 = vmatprep.subr.mxu1 %v584_v0  ;;  %459 = vmatprep.subr.mxu0 %v584_v0 }
  0x45   :  { %431 = vmatpush3.msra.mxu1 %v162_v12  ;;  %460 = vmatpush3.msra.mxu0 %v258_v25 }
  0x46   :  { %432 = vmatprep.subr.mxu1 %v584_v0  ;;  %461 = vmatprep.subr.mxu0 %v584_v0 }
  0x47   :  { %433 = vmatpush3.msra.mxu1 %v161_v13  ;;  %462 = vmatpush3.msra.mxu0 %v257_v26 }
  0x48   :  { %434 = vmatprep.subr.mxu1 %v584_v0  ;;  %463 = vmatprep.subr.mxu0 %v584_v0 }
  0x49   :  { %435 = vmatpush3.msra.mxu1 %v160_v14  ;;  %464 = vmatpush3.msra.mxu0 %v256_v27 }
  0x4a   :  { %436 = vmatprep.subr.mxu1 %v584_v0  ;;  %465 = vmatprep.subr.mxu0 %v584_v0 }
  0x4b   :  { %437 = vmatpush3.msra.mxu1 %v159_v15  ;;  %466 = vmatpush3.msra.mxu0 %v255_v28 }
  0x4c   :  { %438 = vmatprep.subr.mxu1 %v584_v0  ;;  %467 = vmatprep.subr.mxu0 %v584_v0 }
  0x4d   :  { %439 = vmatpush3.msra.mxu1 %v158_v16  ;;  %468 = vmatpush3.msra.mxu0 %v254_v29 }
  0x4e   :  { %440 = vmatprep.subr.mxu1 %v584_v0  ;;  %469 = vmatprep.subr.mxu0 %v584_v0 }
  0x4f   :  { %441 = vmatpush3.msra.mxu1 %v157_v17  ;;  %470 = vmatpush3.msra.mxu0 %v253_v30 }
  0x50   :  { %442 = vmatprep.subr.mxu1 %v584_v0  ;;  %471 = vmatprep.subr.mxu0 %v584_v0 }
  0x51   :  { %443 = vmatpush3.msra.mxu1 %v156_v18  ;;  %472 = vmatpush3.msra.mxu0 %v252_v31 }
  0x52   :  { %444 = vmatprep.subr.mxu1 %v584_v0  ;;  %473 = vmatprep.subr.mxu0 %v584_v0 }
  0x53   :  { %445 = vmatpush3.msra.mxu1 %v155_v19  ;;  %474 = vmatpush3.msra.mxu0 %v251_v32 }
  0x54   :  { %475 = vmatprep.subr.mxu0 %v584_v0 }
  0x55   :  { %476 = vmatpush3.msra.mxu0 %v250_v38 }
  0x56   :  { %477 = vmatprep.subr.mxu0 %v584_v0 }
  0x57   :  { %478 = vmatpush3.msra.mxu0 %v249_v39 }
  0x58   :  { %479 = vmatprep.subr.mxu0 %v584_v0 }
  0x59   :  { %480 = vmatpush3.msra.mxu0 %v248_v40 }
  0xf8   :  { %v150_v34 = vpop.f32.mrf.mxu0 }
  0xf9   :  { %v151_v35 = vadd.f32 %v363_v33, %v150_v34 }
  0xfa   :  { %v413_v36 = vpop.f32.mrf.mxu0 }
  0xfb   :  { %v154_v37 = vmax.f32 %v151_v35, 0.0 }
  0xfd   :  { %447 = vmatmul.mubr.f32.vlgmr.msra.gmra.mxu1 %v154_v37 }
 0x1bd   :  { %v242_v42 = vpop.f32.mrf.mxu1 }
 0x1be   :  { %v243_v43 = vadd.f32 %v366_v41, %v242_v42 }
 0x1bf   :  { %v448_v44 = vpop.f32.mrf.mxu1 }
 0x1c0   :  { %v246_v45 = vmax.f32 %v243_v43, 0.0 }
 0x1c2   :  { %482 = vmatmul.mubr.f32.vlgmr.msra.gmra.mxu0 %v246_v45 }
 0x282   :  { %v335_v47 = vpop.f32.mrf.mxu0 }
 0x283   :  { %v336_v48 = vadd.f32 %v367_v46, %v335_v47 }
 0x284   :  { %v483_v49 = vpop.f32.mrf.mxu0 }
 0x285   :  { %v339_v51 = vmax.f32 %v336_v48, 0.0 }
 0x287   :  { %v345_v52 = vmul.f32 %v368_v50, %v339_v51 }
 0x289   :  { %346 = vadd.xlane.f32.xlu0 %v345_v52 }
 0x312   :  { %v347_v54 = vpop.xlane.xlu0 %346 }
 0x313   :  { %v353_v55 = vadd.f32 %v369_v53, %v347_v54 }
 0x315   :  { %355 = vst.msk [vmem:[%s670_s4] sm:$0xff] %vm354_vm3, %v353_v55 }
 0x316   :  { %360 = vsyncpa [#allocation3], 1 }
 0x317   :  { %361 = vsyncpa [#allocation5], 1 }
 0x318   :  { %362 = vsyncpa [#allocation8], 1 }

</bundles_post_ra>
